<compile_context>
chip_gen: v6e
topology: v6e:2x2x1
jax: 0.10.0
libtpu: 0.0.40
codegen_flags: <defaults>
</compile_context>

<pallas_src>
import numpy as np
import jax
import jax.numpy as jnp
from jax.experimental import pallas as pl
from jax.experimental.pallas import tpu as pltpu

# ---------------- config ("opt") ----------------
TEXT_DIM = 16
VIS_DIM = 16
TRACK_DIM = 8
MLP_DIM = TEXT_DIM + VIS_DIM + 2 * TRACK_DIM      # 48
JOINT = 32
HALF_JOINT = JOINT // 2
MID_M_INTS = 2
GATE_OUT = JOINT * MID_M_INTS                     # 64 (out_dim_ints when gates == 1)
N_CLASSES = 5
N_REL_CLASSES = 3
FEAT = 3 * JOINT                                  # 96 (per-branch output width)
HID = 128                                         # fused per-branch hidden width (4*JOINT)

B = 2            # batch
T = 8            # n_tracks
R = 3            # n_rels derived from features.shape[2] - 1
BT = B * T       # 16 rows (multiple of 8 -> aligned sublane slices)


# ---------------- Pallas kernel (single invocation, whole problem) ----------------
def _kernel(feats_ref, mask_ref, w1_ref, w2_ref, wg_ref, wo_ref, out_ref):
    bt, n_rel = mask_ref.shape               # 16, 3
    d, hid, fw = MLP_DIM, HID, FEAT          # 48, 128, 96

    f = feats_ref[...]                       # [bt, (n_rel+1)*d]  (slot-major lanes, no host repack)
    m = mask_ref[...]                        # [bt, n_rel]

    # ---------- branch layer 1 ----------
    # Fused (ints | ctx rel-0) matmul: LHS lanes 0:48 = slot-0 feats, 48:96 = rel-0 feats.
    # Slab rows 0:48 -> hidden lanes 0:128 (ints), rows 48:96 -> 128:256 (ctx), row 96 = biases.
    b1 = w1_ref[2 * d:2 * d + 1, :]                                        # [1, 256]
    y1 = jnp.maximum(
        jnp.dot(f[:, 0:2 * d], w1_ref[0:2 * d, :],
                preferred_element_type=jnp.float32) + b1, 0.0)             # [bt, 256]
    h_ints = y1[:, 0:hid]                                                  # [bt, 128]

    # Remaining relations reuse the ctx block of the SAME slab (no HBM duplication).  The masked
    # sum over relations is applied to the *hidden* activations: layer 2 is linear so the masked
    # mean commutes with it, shrinking layer-2 M from R*bt to bt rows.
    w1c = w1_ref[d:2 * d, hid:2 * hid]                                     # [48, 128]
    b1c = w1_ref[2 * d:2 * d + 1, hid:2 * hid]                             # [1, 128]
    acc = y1[:, hid:2 * hid] * m[:, 0:1]
    for r in range(1, n_rel):                                              # static unroll (R-1 = 2)
        hr = jnp.maximum(
            jnp.dot(f[:, (r + 1) * d:(r + 2) * d], w1c,
                    preferred_element_type=jnp.float32) + b1c, 0.0)
        acc = acc + hr * m[:, r:r + 1]

    smask = jnp.sum(m, axis=1, keepdims=True)                              # [bt, 1]
    div = jnp.where(smask == 0.0, 1.0, smask)
    inv = pl.reciprocal(div, approx=False) if hasattr(pl, "reciprocal") else 1.0 / div
    hbar = acc * inv                                                       # masked-mean hidden [bt,128]
    ind = smask * inv                                                      # 1.0 if any relation else 0.0

    # ---------- branch layer 2: ONE K=256 matmul ----------
    # x2 lanes 0:128 = ints hidden, 128:256 = ctx hidden (tile-aligned concat = pure vreg placement).
    x2 = jnp.concatenate([h_ints, hbar], axis=1)                           # [bt, 256]
    y2 = jnp.dot(x2, w2_ref[0:2 * hid, :], preferred_element_type=jnp.float32)   # [bt, 192]
    # dense output lanes: 0:96 = ints branch, 96:192 = ctx branch.  The ctx bias is scaled by the
    # "any relation present" indicator (matches divider[div==0]=1 with an all-zero mask row).
    feat = jnp.tanh(y2 + w2_ref[2 * hid:2 * hid + 1, :]
                    + ind * w2_ref[2 * hid + 8:2 * hid + 9, :])            # [bt, 192]

    # ---------- gating unit: single K=192 matmul (structural zero rows removed) ----------
    gated = jnp.maximum(
        jnp.dot(feat, wg_ref[0:2 * fw, :], preferred_element_type=jnp.float32)
        + wg_ref[2 * fw:2 * fw + 1, :], 0.0)                               # [bt, 64]

    # ---------- output heads: one packed slab; disjoint output lanes (0:5 inters, 5:8 rels) ------
    out_ref[...] = (
        jnp.dot(gated, wo_ref[0:GATE_OUT, :], preferred_element_type=jnp.float32)
        + jnp.dot(feat[:, fw:2 * fw], wo_ref[GATE_OUT:GATE_OUT + fw, :],
                  preferred_element_type=jnp.float32)
        + wo_ref[GATE_OUT + fw:GATE_OUT + fw + 1, :])                      # [bt, 8]


# ---------------- host-side parameter packing ----------------
def _block_diag(mats):
    rows = sum(m.shape[0] for m in mats)
    cols = sum(m.shape[1] for m in mats)
    out = np.zeros((rows, cols), np.float32)
    r = c = 0
    for m in mats:
        out[r:r + m.shape[0], c:c + m.shape[1]] = np.asarray(m, np.float32)
        r += m.shape[0]
        c += m.shape[1]
    return out


def _round8(n):
    return ((n + 7) // 8) * 8


def pack_params(params):
    p = {k: (np.asarray(w, np.float32), np.asarray(b, np.float32)) for k, (w, b) in params.items()}

    def branch(sfx, layer2):
        names = ("txt2", "vis2", "tracks12", "tracks22") if layer2 else ("txt", "vis", "tracks1", "tracks2")
        w = _block_diag([p[n + sfx][0] for n in names])
        b = np.concatenate([p[n + sfx][1] for n in names])
        return w, b

    w1i, b1i = branch("_ints", False)     # [48,128], [128]
    w1c, b1c = branch("_ctx", False)
    w2i, b2i = branch("_ints", True)      # [128, 96], [96]
    w2c, b2c = branch("_ctx", True)

    # layer-1 slab [104, 256]: block-diagonal across branches, row 96 = [b1_ints | b1_ctx].
    w1 = np.zeros((_round8(2 * MLP_DIM + 1), 2 * HID), np.float32)
    w1[0:MLP_DIM, 0:HID] = w1i
    w1[MLP_DIM:2 * MLP_DIM, HID:2 * HID] = w1c
    w1[2 * MLP_DIM, 0:HID] = b1i
    w1[2 * MLP_DIM, HID:2 * HID] = b1c

    # layer-2 slab [272, 192]: K=256 block-diagonal, output lanes packed densely
    # (ints -> 0:96, ctx -> 96:192); rows 256 / 264 hold the ints / ctx bias (8-aligned rows).
    w2 = np.zeros((_round8(2 * HID + 8 + 1), 2 * FEAT), np.float32)
    w2[0:HID, 0:FEAT] = w2i
    w2[HID:2 * HID, FEAT:2 * FEAT] = w2c
    w2[2 * HID, 0:FEAT] = b2i
    w2[2 * HID + 8, FEAT:2 * FEAT] = b2c

    # gate slab [200, 64]: K=192 with the structural zero rows removed.  Kernel feeds lanes
    # [ints(0:96) | ctx(96:192)] while the torch gate input is cat(ctx, ints) -> swap halves here.
    wg_t, bg = p["gates"]                                   # [192, 64], [64]
    wg = np.zeros((_round8(2 * FEAT + 1), GATE_OUT), np.float32)
    wg[0:FEAT, :] = wg_t[FEAT:2 * FEAT]                     # rows multiplying the ints features
    wg[FEAT:2 * FEAT, :] = wg_t[0:FEAT]                     # rows multiplying the ctx features
    wg[2 * FEAT, :] = bg

    # head slab [168, 8]: rows 0:64 -> inters lanes 0:5, rows 64:160 -> rels lanes 5:8, row 160 = biases.
    woi, boi = p["out_ints"]                                # [64, 5], [5]
    woc, boc = p["out_ctx"]                                 # [96, 3], [3]
    wo = np.zeros((_round8(GATE_OUT + FEAT + 1), N_CLASSES + N_REL_CLASSES), np.float32)
    wo[0:GATE_OUT, 0:N_CLASSES] = woi
    wo[GATE_OUT:GATE_OUT + FEAT, N_CLASSES:] = woc
    wo[GATE_OUT + FEAT, 0:N_CLASSES] = boi
    wo[GATE_OUT + FEAT, N_CLASSES:] = boc

    # The split matmuls in the kernel rely on the structural zero blocks written above
    # (off-diagonal blocks of w1/w2 and the cross-lane blocks of wo).  Never fill these regions.
    assert not w1[0:MLP_DIM, HID:].any() and not w1[MLP_DIM:2 * MLP_DIM, 0:HID].any()
    assert not w2[0:HID, FEAT:].any() and not w2[HID:2 * HID, 0:FEAT].any()
    assert not wo[0:GATE_OUT, N_CLASSES:].any() and not wo[GATE_OUT:GATE_OUT + FEAT, 0:N_CLASSES].any()

    return tuple(jnp.asarray(a) for a in (w1, w2, wg, wo))


# ---------------- wrapper ----------------
def _vmem_spec():
    space = getattr(pltpu, "MemorySpace", None) or getattr(pltpu, "TPUMemorySpace", None)
    return pl.BlockSpec(memory_space=space.VMEM) if space is not None else None


def mid_fusion_forward(features, rels_mask, packed):
    """features: [B, T, R+1, MLP_DIM] f32, rels_mask: [B, T, R] f32.
    Returns {'inters': [B, T, N_CLASSES], 'rels': [B, T, N_REL_CLASSES]}."""
    b, t = features.shape[0], features.shape[1]
    n_rel = features.shape[2] - 1
    bt = b * t

    # Free reshapes only (no transpose / concatenate): slot slicing happens inside the kernel.
    feats = features.reshape(bt, (n_rel + 1) * MLP_DIM).astype(jnp.float32)
    mask = rels_mask.reshape(bt, n_rel).astype(jnp.float32)
    w1, w2, wg, wo = packed

    kwargs = {}
    spec = _vmem_spec()
    if spec is not None:
        kwargs["in_specs"] = [spec] * 6
        kwargs["out_specs"] = spec
    if hasattr(pl, "CostEstimate"):
        kwargs["cost_estimate"] = pl.CostEstimate(
            flops=3_200_000, transcendentals=3_100, bytes_accessed=385_000)

    out = pl.pallas_call(
        _kernel,
        out_shape=jax.ShapeDtypeStruct((bt, N_CLASSES + N_REL_CLASSES), jnp.float32),
        **kwargs,
    )(feats, mask, w1, w2, wg, wo)

    return {
        "inters": out[:, :N_CLASSES].reshape(b, t, N_CLASSES),
        "rels": out[:, N_CLASSES:].reshape(b, t, N_REL_CLASSES),
    }


# ---------------- deterministic parameter init ----------------
LAYERS = [
    ("txt_ints", TEXT_DIM, JOINT), ("txt2_ints", JOINT, JOINT),
    ("vis_ints", VIS_DIM, JOINT), ("vis2_ints", JOINT, JOINT),
    ("tracks1_ints", TRACK_DIM, JOINT), ("tracks2_ints", TRACK_DIM, JOINT),
    ("tracks12_ints", JOINT, HALF_JOINT), ("tracks22_ints", JOINT, HALF_JOINT),
    ("txt_ctx", TEXT_DIM, JOINT), ("txt2_ctx", JOINT, JOINT),
    ("vis_ctx", VIS_DIM, JOINT), ("vis2_ctx", JOINT, JOINT),
    ("tracks1_ctx", TRACK_DIM, JOINT), ("tracks2_ctx", TRACK_DIM, JOINT),
    ("tracks12_ctx", JOINT, HALF_JOINT), ("tracks22_ctx", JOINT, HALF_JOINT),
    ("gates", 6 * JOINT, GATE_OUT),
    ("out_ints", GATE_OUT, N_CLASSES),
    ("out_ctx", 3 * JOINT, N_REL_CLASSES),
]


def _init_linear(key, d_in, d_out):
    kw, kb = jax.random.split(key)
    w = (jax.random.normal(kw, (d_in, d_out), jnp.float32) / np.sqrt(d_in)).astype(jnp.float32)
    b = (0.01 * jax.random.normal(kb, (d_out,), jnp.float32)).astype(jnp.float32)
    return w, b


def make_params(key):
    keys = jax.random.split(key, len(LAYERS))
    return {name: _init_linear(k, di, do) for k, (name, di, do) in zip(keys, LAYERS)}


# ---------------- pure-JAX reference (sanity check against unpacked params) ----------------
def reference_forward(features, rels_mask, params):
    hi = jax.lax.Precision.HIGHEST     # keep the XLA reference at true f32 matmul precision

    def lin(x, name):
        w, b = params[name]
        return jnp.dot(x, w, precision=hi) + b

    def mlp2(x, n1, n2):
        return lin(jnp.maximum(lin(x, n1), 0.0), n2)

    b_, t_ = features.shape[0], features.shape[1]
    n_rel = features.shape[2] - 1
    bt = b_ * t_
    f = features.reshape(bt, n_rel + 1, MLP_DIM).astype(jnp.float32)
    m = rels_mask.reshape(bt, n_rel).astype(jnp.float32)

    f0 = f[:, 0, :]
    txt_i = mlp2(f0[:, :TEXT_DIM], "txt_ints", "txt2_ints")
    vis_i = mlp2(f0[:, TEXT_DIM:TEXT_DIM + VIS_DIM], "vis_ints", "vis2_ints")
    tr0 = f0[:, TEXT_DIM + VIS_DIM:]
    t1_i = mlp2(tr0[:, :TRACK_DIM], "tracks1_ints", "tracks12_ints")
    t2_i = mlp2(tr0[:, TRACK_DIM:], "tracks2_ints", "tracks22_ints")
    oi = jnp.tanh(jnp.concatenate([txt_i, vis_i, t1_i, t2_i], axis=-1))

    div = jnp.sum(m, axis=1, keepdims=True)
    div = jnp.where(div == 0.0, 1.0, div)
    fr = f[:, 1:, :].reshape(bt * n_rel, MLP_DIM)
    txt_c = mlp2(fr[:, :TEXT_DIM], "txt_ctx", "txt2_ctx").reshape(bt, n_rel, JOINT)
    vis_c = mlp2(fr[:, TEXT_DIM:TEXT_DIM + VIS_DIM], "vis_ctx", "vis2_ctx").reshape(bt, n_rel, JOINT)
    trc = fr[:, TEXT_DIM + VIS_DIM:]
    t1_c = mlp2(trc[:, :TRACK_DIM], "tracks1_ctx", "tracks12_ctx").reshape(bt, n_rel, HALF_JOINT)
    t2_c = mlp2(trc[:, TRACK_DIM:], "tracks2_ctx", "tracks22_ctx").reshape(bt, n_rel, HALF_JOINT)
    mm = m[:, :, None]
    oc = jnp.tanh(jnp.concatenate([(txt_c * mm).sum(1) / div, (vis_c * mm).sum(1) / div,
                                   (t1_c * mm).sum(1) / div, (t2_c * mm).sum(1) / div], axis=-1))

    gated = jnp.maximum(jnp.dot(jnp.concatenate([oc, oi], axis=-1), params["gates"][0],
                                precision=hi) + params["gates"][1], 0.0)
    out_i = (jnp.dot(gated, params["out_ints"][0], precision=hi)
             + params["out_ints"][1]).reshape(b_, t_, N_CLASSES)
    out_c = (jnp.dot(oc, params["out_ctx"][0], precision=hi)
             + params["out_ctx"][1]).reshape(b_, t_, N_REL_CLASSES)
    return {"inters": out_i, "rels": out_c}


if __name__ == "__main__":
    key = jax.random.PRNGKey(0)
    k_feat, k_mask, k_param = jax.random.split(key, 3)

    features = jax.random.normal(k_feat, (B, T, R + 1, MLP_DIM), jnp.float32)
    rels_mask = (jax.random.uniform(k_mask, (B, T, R)) > 0.3).astype(jnp.float32)
    params = make_params(k_param)
    packed = pack_params(params)

    out = mid_fusion_forward(features, rels_mask, packed)
    out = jax.block_until_ready(out)

    ref = jax.block_until_ready(reference_forward(features, rels_mask, params))
    assert out["inters"].shape == (B, T, N_CLASSES)
    assert out["rels"].shape == (B, T, N_REL_CLASSES)
    # 2e-4 tolerance: the kernel uses the MXU multi-pass f32 path; the reference uses XLA HIGHEST.
    assert jnp.allclose(out["inters"], ref["inters"], rtol=2e-4, atol=2e-4), \
        float(jnp.max(jnp.abs(out["inters"] - ref["inters"])))
    assert jnp.allclose(out["rels"], ref["rels"], rtol=2e-4, atol=2e-4), \
        float(jnp.max(jnp.abs(out["rels"] - ref["rels"])))

    print("KERNEL_OK")
</pallas_src>

<mosaic_0001>
module attributes {stable_mosaic.version = 11 : i64} {
  func.func @_kernel(%arg0: memref<16x192xf32, #tpu.memory_space<vmem>>, %arg1: memref<16x3xf32, #tpu.memory_space<vmem>>, %arg2: memref<104x256xf32, #tpu.memory_space<vmem>>, %arg3: memref<272x192xf32, #tpu.memory_space<vmem>>, %arg4: memref<200x64xf32, #tpu.memory_space<vmem>>, %arg5: memref<168x8xf32, #tpu.memory_space<vmem>>, %arg6: memref<16x8xf32, #tpu.memory_space<vmem>>) attributes {dimension_semantics = [], scalar_prefetch = 0 : i64, scratch_operands = 0 : i64, tpu.core_type = #tpu.core_type<tc>} {
    %c0 = arith.constant 0 : index
    %c0_0 = arith.constant 0 : index
    %0 = vector.load %arg0[%c0, %c0_0] : memref<16x192xf32, #tpu.memory_space<vmem>>, vector<16x192xf32>
    %c0_1 = arith.constant 0 : index
    %c0_2 = arith.constant 0 : index
    %1 = vector.load %arg1[%c0_1, %c0_2] : memref<16x3xf32, #tpu.memory_space<vmem>>, vector<16x3xf32>
    %c96 = arith.constant 96 : index
    %c0_3 = arith.constant 0 : index
    %2 = vector.load %arg2[%c96, %c0_3] : memref<104x256xf32, #tpu.memory_space<vmem>>, vector<1x256xf32>
    %3 = vector.extract_strided_slice %0 {offsets = [0, 0], sizes = [16, 96], strides = [1, 1]} : vector<16x192xf32> to vector<16x96xf32>
    %c0_4 = arith.constant 0 : index
    %c0_5 = arith.constant 0 : index
    %4 = vector.load %arg2[%c0_4, %c0_5] : memref<104x256xf32, #tpu.memory_space<vmem>>, vector<96x256xf32>
    %cst = arith.constant dense<0.000000e+00> : vector<16x256xf32>
    %5 = tpu.matmul %3, %4, %cst {dimension_numbers = #tpu.dot_dimension_numbers<[1], [0], [0], [1], [0, 0, 1, 1], [], []>} : vector<16x96xf32>, vector<96x256xf32>, vector<16x256xf32> -> vector<16x256xf32>
    %6 = vector.broadcast %2 : vector<1x256xf32> to vector<16x256xf32>
    %7 = arith.addf %5, %6 : vector<16x256xf32>
    %cst_6 = arith.constant 0.000000e+00 : f32
    %8 = vector.broadcast %cst_6 : f32 to vector<16x256xf32>
    %9 = arith.maximumf %7, %8 : vector<16x256xf32>
    %10 = vector.extract_strided_slice %9 {offsets = [0, 0], sizes = [16, 128], strides = [1, 1]} : vector<16x256xf32> to vector<16x128xf32>
    %c48 = arith.constant 48 : index
    %c128 = arith.constant 128 : index
    %11 = vector.load %arg2[%c48, %c128] : memref<104x256xf32, #tpu.memory_space<vmem>>, vector<48x128xf32>
    %c96_7 = arith.constant 96 : index
    %c128_8 = arith.constant 128 : index
    %12 = vector.load %arg2[%c96_7, %c128_8] : memref<104x256xf32, #tpu.memory_space<vmem>>, vector<1x128xf32>
    %13 = vector.extract_strided_slice %9 {offsets = [0, 128], sizes = [16, 128], strides = [1, 1]} : vector<16x256xf32> to vector<16x128xf32>
    %14 = vector.extract_strided_slice %1 {offsets = [0, 0], sizes = [16, 1], strides = [1, 1]} : vector<16x3xf32> to vector<16x1xf32>
    %15 = vector.broadcast %14 : vector<16x1xf32> to vector<16x128xf32>
    %16 = arith.mulf %13, %15 : vector<16x128xf32>
    %17 = vector.extract_strided_slice %0 {offsets = [0, 96], sizes = [16, 48], strides = [1, 1]} : vector<16x192xf32> to vector<16x48xf32>
    %cst_9 = arith.constant dense<0.000000e+00> : vector<16x128xf32>
    %18 = tpu.matmul %17, %11, %cst_9 {dimension_numbers = #tpu.dot_dimension_numbers<[1], [0], [0], [1], [0, 0, 1, 1], [], []>} : vector<16x48xf32>, vector<48x128xf32>, vector<16x128xf32> -> vector<16x128xf32>
    %19 = vector.broadcast %12 : vector<1x128xf32> to vector<16x128xf32>
    %20 = arith.addf %18, %19 : vector<16x128xf32>
    %cst_10 = arith.constant 0.000000e+00 : f32
    %21 = vector.broadcast %cst_10 : f32 to vector<16x128xf32>
    %22 = arith.maximumf %20, %21 : vector<16x128xf32>
    %23 = vector.extract_strided_slice %1 {offsets = [0, 1], sizes = [16, 1], strides = [1, 1]} : vector<16x3xf32> to vector<16x1xf32>
    %24 = vector.broadcast %23 : vector<16x1xf32> to vector<16x128xf32>
    %25 = arith.mulf %22, %24 : vector<16x128xf32>
    %26 = arith.addf %16, %25 : vector<16x128xf32>
    %27 = vector.extract_strided_slice %0 {offsets = [0, 144], sizes = [16, 48], strides = [1, 1]} : vector<16x192xf32> to vector<16x48xf32>
    %cst_11 = arith.constant dense<0.000000e+00> : vector<16x128xf32>
    %28 = tpu.matmul %27, %11, %cst_11 {dimension_numbers = #tpu.dot_dimension_numbers<[1], [0], [0], [1], [0, 0, 1, 1], [], []>} : vector<16x48xf32>, vector<48x128xf32>, vector<16x128xf32> -> vector<16x128xf32>
    %29 = vector.broadcast %12 : vector<1x128xf32> to vector<16x128xf32>
    %30 = arith.addf %28, %29 : vector<16x128xf32>
    %cst_12 = arith.constant 0.000000e+00 : f32
    %31 = vector.broadcast %cst_12 : f32 to vector<16x128xf32>
    %32 = arith.maximumf %30, %31 : vector<16x128xf32>
    %33 = vector.extract_strided_slice %1 {offsets = [0, 2], sizes = [16, 1], strides = [1, 1]} : vector<16x3xf32> to vector<16x1xf32>
    %34 = vector.broadcast %33 : vector<16x1xf32> to vector<16x128xf32>
    %35 = arith.mulf %32, %34 : vector<16x128xf32>
    %36 = arith.addf %26, %35 : vector<16x128xf32>
    %cst_13 = arith.constant dense<0.000000e+00> : vector<16xf32>
    %37 = vector.multi_reduction <add>, %1, %cst_13 [1] : vector<16x3xf32> to vector<16xf32>
    %38 = vector.shape_cast %37 : vector<16xf32> to vector<16x1xf32>
    %cst_14 = arith.constant 0.000000e+00 : f32
    %39 = vector.broadcast %cst_14 : f32 to vector<16x1xf32>
    %40 = arith.cmpf oeq, %38, %39 : vector<16x1xf32>
    %cst_15 = arith.constant 1.000000e+00 : f32
    %41 = vector.broadcast %cst_15 : f32 to vector<16x1xf32>
    %42 = arith.select %40, %41, %38 : vector<16x1xi1>, vector<16x1xf32>
    %43 = tpu.reciprocal %42 : vector<16x1xf32> -> vector<16x1xf32>
    %44 = vector.broadcast %43 : vector<16x1xf32> to vector<16x128xf32>
    %45 = arith.mulf %36, %44 : vector<16x128xf32>
    %46 = arith.mulf %38, %43 : vector<16x1xf32>
    %47 = tpu.concatenate %10, %45 in 1 : vector<16x128xf32>, vector<16x128xf32> -> vector<16x256xf32>
    %c0_16 = arith.constant 0 : index
    %c0_17 = arith.constant 0 : index
    %48 = vector.load %arg3[%c0_16, %c0_17] : memref<272x192xf32, #tpu.memory_space<vmem>>, vector<256x192xf32>
    %cst_18 = arith.constant dense<0.000000e+00> : vector<16x192xf32>
    %49 = tpu.matmul %47, %48, %cst_18 {dimension_numbers = #tpu.dot_dimension_numbers<[1], [0], [0], [1], [0, 0, 1, 1], [], []>} : vector<16x256xf32>, vector<256x192xf32>, vector<16x192xf32> -> vector<16x192xf32>
    %c256 = arith.constant 256 : index
    %c0_19 = arith.constant 0 : index
    %50 = vector.load %arg3[%c256, %c0_19] : memref<272x192xf32, #tpu.memory_space<vmem>>, vector<1x192xf32>
    %51 = vector.broadcast %50 : vector<1x192xf32> to vector<16x192xf32>
    %52 = arith.addf %49, %51 : vector<16x192xf32>
    %c264 = arith.constant 264 : index
    %c0_20 = arith.constant 0 : index
    %53 = vector.load %arg3[%c264, %c0_20] : memref<272x192xf32, #tpu.memory_space<vmem>>, vector<1x192xf32>
    %54 = vector.broadcast %46 : vector<16x1xf32> to vector<16x192xf32>
    %55 = vector.broadcast %53 : vector<1x192xf32> to vector<16x192xf32>
    %56 = arith.mulf %54, %55 : vector<16x192xf32>
    %57 = arith.addf %52, %56 : vector<16x192xf32>
    %58 = math.tanh %57 : vector<16x192xf32>
    %c0_21 = arith.constant 0 : index
    %c0_22 = arith.constant 0 : index
    %59 = vector.load %arg4[%c0_21, %c0_22] : memref<200x64xf32, #tpu.memory_space<vmem>>, vector<192x64xf32>
    %cst_23 = arith.constant dense<0.000000e+00> : vector<16x64xf32>
    %60 = tpu.matmul %58, %59, %cst_23 {dimension_numbers = #tpu.dot_dimension_numbers<[1], [0], [0], [1], [0, 0, 1, 1], [], []>} : vector<16x192xf32>, vector<192x64xf32>, vector<16x64xf32> -> vector<16x64xf32>
    %c192 = arith.constant 192 : index
    %c0_24 = arith.constant 0 : index
    %61 = vector.load %arg4[%c192, %c0_24] : memref<200x64xf32, #tpu.memory_space<vmem>>, vector<1x64xf32>
    %62 = vector.broadcast %61 : vector<1x64xf32> to vector<16x64xf32>
    %63 = arith.addf %60, %62 : vector<16x64xf32>
    %cst_25 = arith.constant 0.000000e+00 : f32
    %64 = vector.broadcast %cst_25 : f32 to vector<16x64xf32>
    %65 = arith.maximumf %63, %64 : vector<16x64xf32>
    %c0_26 = arith.constant 0 : index
    %c0_27 = arith.constant 0 : index
    %66 = vector.load %arg5[%c0_26, %c0_27] : memref<168x8xf32, #tpu.memory_space<vmem>>, vector<64x8xf32>
    %cst_28 = arith.constant dense<0.000000e+00> : vector<16x8xf32>
    %67 = tpu.matmul %65, %66, %cst_28 {dimension_numbers = #tpu.dot_dimension_numbers<[1], [0], [0], [1], [0, 0, 1, 1], [], []>} : vector<16x64xf32>, vector<64x8xf32>, vector<16x8xf32> -> vector<16x8xf32>
    %68 = vector.extract_strided_slice %58 {offsets = [0, 96], sizes = [16, 96], strides = [1, 1]} : vector<16x192xf32> to vector<16x96xf32>
    %c64 = arith.constant 64 : index
    %c0_29 = arith.constant 0 : index
    %69 = vector.load %arg5[%c64, %c0_29] : memref<168x8xf32, #tpu.memory_space<vmem>>, vector<96x8xf32>
    %cst_30 = arith.constant dense<0.000000e+00> : vector<16x8xf32>
    %70 = tpu.matmul %68, %69, %cst_30 {dimension_numbers = #tpu.dot_dimension_numbers<[1], [0], [0], [1], [0, 0, 1, 1], [], []>} : vector<16x96xf32>, vector<96x8xf32>, vector<16x8xf32> -> vector<16x8xf32>
    %71 = arith.addf %67, %70 : vector<16x8xf32>
    %c160 = arith.constant 160 : index
    %c0_31 = arith.constant 0 : index
    %72 = vector.load %arg5[%c160, %c0_31] : memref<168x8xf32, #tpu.memory_space<vmem>>, vector<1x8xf32>
    %73 = vector.broadcast %72 : vector<1x8xf32> to vector<16x8xf32>
    %74 = arith.addf %71, %73 : vector<16x8xf32>
    %c0_32 = arith.constant 0 : index
    %c0_33 = arith.constant 0 : index
    %75 = vector.load %arg6[%c0_32, %c0_33] : memref<16x8xf32, #tpu.memory_space<vmem>>, vector<16x8xf32>
    tpu.vector_store %arg6[%c0_32, %c0_33], %74 {strides = array<i32>} : memref<16x8xf32, #tpu.memory_space<vmem>>, vector<16x8xf32>,
    return
  }
}

</mosaic_0001>

<bundles_post_ra>
// kernel: tpu_custom_call.1
= control target key start
LH: loop header
LB: loop body
LE: loop exit
PB: predicated region body
PF: predicated region fallthrough
CT: control target
= control target key end

     0   :  { %11 = vsyncpa [#allocation3], 0  ;;  %s1082_s21 = smov [#allocation2]   ;;  %s1495_s0 = inlined_call_operand.vmem [shape: f32[16,192], index: 0, kind: input, shape index: {}]   ;;  %s1496_s1 = inlined_call_operand.vmem [shape: f32[16,3], index: 1, kind: input, shape index: {}]   ;;  %s1497_s2 = inlined_call_operand.vmem [shape: f32[104,256], index: 2, kind: input, shape index: {}]   ;;  %s1498_s3 = inlined_call_operand.hbm [shape: f32[272,192], index: 3, kind: input, shape index: {}]   ;;  %s1499_s4 = inlined_call_operand.vmem [shape: f32[200,64], index: 4, kind: input, shape index: {}]   ;;  %s1500_s5 = inlined_call_operand.vmem [shape: f32[168,8], index: 5, kind: input, shape index: {}]   ;;  %s1501_s6 = inlined_call_operand.vmem [shape: f32[16,8], index: 6, kind: output, shape index: {}]  }
   0x1   :  { %s23_s22 = sshll.u32 %s1082_s21, 4  ;;  %s24_s22 = int_to_ptr.vmem [resolvable:$true] %s23_s22 }
   0x2   :  { %s1068_s23 = scalar_lea.vmem %s24_s22, 8704  ;;  %p1073_p1 = scmp.lt.s32.totalorder %s24_s22, %s24_s22 }
   0x3   :  { %p1069_p0 = scmp.ne.s32.totalorder %s24_s22, %s1068_s23  ;;  %p1074_p2 = scmp.lt.s32.totalorder %s1068_s23, %s1068_s23 }
   0x5   :  { %p1075_p3 = por %p1074_p2, %p1073_p1 }
   0x7   :  { %p1076_p4 = pnand %p1075_p3, %p1069_p0 }
   0x9   :  { %1079 = shalt.err (!%p1076_p4)
}
   0xa   :  { %s1083_s24 = smov 256   ;;  %s1084_s25 = smov 16  }
   0xb   :  { %29 = dma.hbm_to_vmem [thread:$0]  %s1498_s3, 8704, %s24_s22, [#allocation3], %s1083_s24, %s1083_s24, %s1084_s25  }
   0xc   :  { %1080 = dma.done.wait [#allocation3], 8704  }
   0xd   :  { %1081 = vsyncadd [#allocation3], 4294958592  ;;  %v1085_v0 = vmov 0.0   ;;  %v1133_v1 = vld [vmem:[%s1495_s0 + $0x10] sm:$0xff]  ;;  %v1138_v2 = vld [vmem:[%s1495_s0] sm:$0xff]  ;;  %s1086_s8 = smov 32  }
   0xe   :  { %151 = vmatprep.mubr.f32.mxu0 %v1085_v0  ;;  %187 = vrot.lane.b32.xlu1 %v1133_v1, %s1086_s8  ;;  %v40_v3 = vld [vmem:[%s1495_s0 + $0x18] sm:$0xff]  ;;  %v38_v5 = vld [vmem:[%s1495_s0 + $0x8] sm:$0xff]  ;;  %v67_v6 = vld [vmem:[%s1497_s2 + $0xb0] sm:$0xff]  ;;  %s1087_s27 = smov 112   ;;  %v1088_v22 = vmov 1   ;;  %v1089_v24 = vmov 0  }
   0xf   :  { %183 = vrot.lane.b32.xlu0 %v1138_v2, %s1086_s8  ;;  %v1150_v4 = vld [vmem:[%s1497_s2 + $0xb8] sm:$0xff]  ;;  %v1162_v7 = vld [vmem:[%s1497_s2 + $0xa8] sm:$0xff]  ;;  %v65_v8 = vld [vmem:[%s1497_s2 + $0xa0] sm:$0xff]  ;;  %1042 = vset.pattern.permute.xlu1 %v1088_v22  ;;  %vm80_vm0 = vcmask 785408   ;;  %vm385_vm1 = vcmask 23552   ;;  %v1090_v56 = vmov 2  }
  0x10   :  { %95 = vmatprep.subr.mxu0 %v1150_v4  ;;  %956 = vmatprep.subr.mxu1 %v1150_v4  ;;  %v1173_v9 = vld [vmem:[%s1497_s2 + $0x98] sm:$0xff]  ;;  %v63_v10 = vld [vmem:[%s1497_s2 + $0x90] sm:$0xff]  ;;  %v1186_v11 = vld [vmem:[%s1497_s2 + $0x88] sm:$0xff]  ;;  %vm191_vm2 = vcmask 261120   ;;  %vm194_vm3 = vcmask 392192   ;;  %vm610_vm6 = vcmask 523264  }
  0x11   :  { %96 = vmatpush1.msra.mxu0 %v67_v6  ;;  %957 = vmatpush3.msra.mxu1 %v1150_v4  ;;  %v61_v12 = vld [vmem:[%s1497_s2 + $0x80] sm:$0xff]  ;;  %v1196_v13 = vld [vmem:[%s1497_s2 + $0x78] sm:$0xff]  ;;  %v59_v14 = vld [vmem:[%s1497_s2 + $0x70] sm:$0xff]  ;;  %vm893_vm7 = vcmask 64512  }
  0x12   :  { %97 = vmatprep.subr.mxu0 %v1162_v7  ;;  %958 = vmatprep.subr.mxu1 %v1162_v7  ;;  %v1206_v15 = vld [vmem:[%s1497_s2 + $0x68] sm:$0xff]  ;;  %v57_v16 = vld [vmem:[%s1497_s2 + $0x60] sm:$0xff]  ;;  %v56_v17 = vld [vmem:[%s1497_s2 + $0x58] sm:$0xff] }
  0x13   :  { %189 = vrot.lane.b32.xlu1 %v40_v3, %s1086_s8  ;;  %185 = vrot.lane.b32.xlu0 %v38_v5, %s1086_s8  ;;  %v55_v18 = vld [vmem:[%s1497_s2 + $0x50] sm:$0xff]  ;;  %v54_v19 = vld [vmem:[%s1497_s2 + $0x48] sm:$0xff]  ;;  %v433_v31 = vld [vmem:[#allocation2 + $0xf8] sm:$0xff] }
  0x14   :  { %98 = vmatpush1.msra.mxu0 %v65_v8  ;;  %959 = vmatpush3.msra.mxu1 %v1162_v7  ;;  %v53_v20 = vld [vmem:[%s1497_s2 + $0x40] sm:$0xff]  ;;  %v52_v21 = vld [vmem:[%s1497_s2 + $0x38] sm:$0xff]  ;;  %v51_v23 = vld [vmem:[%s1497_s2 + $0x30] sm:$0xff] }
  0x15   :  { %99 = vmatprep.subr.mxu0 %v1173_v9  ;;  %960 = vmatprep.subr.mxu1 %v1173_v9  ;;  %v50_v25 = vld [vmem:[%s1497_s2 + $0x28] sm:$0xff]  ;;  %v49_v26 = vld [vmem:[%s1497_s2 + $0x20] sm:$0xff]  ;;  %v48_v27 = vld [vmem:[%s1497_s2 + $0x18] sm:$0xff] }
  0x16   :  { %100 = vmatpush1.msra.mxu0 %v63_v10  ;;  %961 = vmatpush3.msra.mxu1 %v1173_v9  ;;  %v47_v28 = vld [vmem:[%s1497_s2 + $0x10] sm:$0xff]  ;;  %v46_v29 = vld [vmem:[%s1497_s2 + $0x8] sm:$0xff]  ;;  %v45_v30 = vld [vmem:[%s1497_s2] sm:$0xff] }
  0x17   :  { %288 = vrot.lane.b32.xlu0 %v38_v5, %s1087_s27  ;;  %290 = vrot.lane.b32.xlu1 %v40_v3, %s1087_s27  ;;  %v432_v32 = vld [vmem:[#allocation2 + $0xf0] sm:$0xff]  ;;  %v431_v33 = vld [vmem:[#allocation2 + $0xe8] sm:$0xff]  ;;  %v430_v34 = vld [vmem:[#allocation2 + $0xe0] sm:$0xff] }
  0x18   :  { %101 = vmatprep.subr.mxu0 %v1186_v11  ;;  %962 = vmatprep.subr.mxu1 %v1186_v11  ;;  %v429_v35 = vld [vmem:[#allocation2 + $0xd8] sm:$0xff]  ;;  %v428_v36 = vld [vmem:[#allocation2 + $0xd0] sm:$0xff]  ;;  %v427_v37 = vld [vmem:[#allocation2 + $0xc8] sm:$0xff] }
  0x19   :  { %102 = vmatpush1.msra.mxu0 %v61_v12  ;;  %963 = vmatpush3.msra.mxu1 %v1186_v11  ;;  %v426_v38 = vld [vmem:[#allocation2 + $0xc0] sm:$0xff]  ;;  %v425_v39 = vld [vmem:[#allocation2 + $0xb8] sm:$0xff]  ;;  %v424_v41 = vld [vmem:[#allocation2 + $0xb0] sm:$0xff] }
  0x1a   :  { %103 = vmatprep.subr.mxu0 %v1196_v13  ;;  %964 = vmatprep.subr.mxu1 %v1196_v13  ;;  %v41_v40 = vld [vmem:[%s1496_s1] sm:$0xff]  ;;  %v423_v42 = vld [vmem:[#allocation2 + $0xa8] sm:$0xff]  ;;  %v421_v45 = vld [vmem:[#allocation2 + $0x98] sm:$0xff] }
  0x1b   :  { %104 = vmatpush1.msra.mxu0 %v59_v14  ;;  %965 = vmatpush3.msra.mxu1 %v1196_v13  ;;  %v422_v43 = vld [vmem:[#allocation2 + $0xa0] sm:$0xff]  ;;  %v386_v44 = vsel %vm385_vm1, %v41_v40, 0.0  ;;  %v420_v46 = vld [vmem:[#allocation2 + $0x90] sm:$0xff]  ;;  %v42_v47 = vld [vmem:[%s1496_s1 + $0x8] sm:$0xff] }
  0x1c   :  { %105 = vmatprep.subr.mxu0 %v1206_v15  ;;  %966 = vmatprep.subr.mxu1 %v1206_v15  ;;  %v419_v48 = vld [vmem:[#allocation2 + $0x88] sm:$0xff]  ;;  %v418_v49 = vld [vmem:[#allocation2 + $0x80] sm:$0xff]  ;;  %v417_v50 = vld [vmem:[#allocation2 + $0x78] sm:$0xff]  ;;  %v389_v51 = vsel %vm385_vm1, %v42_v47, 0.0 }
  0x1d   :  { %106 = vmatpush1.msra.mxu0 %v57_v16  ;;  %967 = vmatpush3.msra.mxu1 %v1206_v15  ;;  %v416_v52 = vld [vmem:[#allocation2 + $0x70] sm:$0xff]  ;;  %v415_v53 = vld [vmem:[#allocation2 + $0x68] sm:$0xff]  ;;  %v414_v54 = vld [vmem:[#allocation2 + $0x60] sm:$0xff] }
  0x1e   :  { %107 = vmatprep.subr.mxu0 %v56_v17  ;;  %971 = vmatprep.subr.mxu1 %v1150_v4  ;;  %v413_v55 = vld [vmem:[#allocation2 + $0x58] sm:$0xff]  ;;  %v412_v57 = vld [vmem:[#allocation2 + $0x50] sm:$0xff]  ;;  %v411_v58 = vld [vmem:[#allocation2 + $0x48] sm:$0xff] }
  0x1f   :  { %108 = vmatpush1.msra.mxu0 %v55_v18  ;;  %1041 = vset.pattern.permute.xlu0 %v1089_v24  ;;  %v410_v59 = vld [vmem:[#allocation2 + $0x40] sm:$0xff]  ;;  %v409_v60 = vld [vmem:[#allocation2 + $0x38] sm:$0xff]  ;;  %v408_v61 = vld [vmem:[#allocation2 + $0x30] sm:$0xff] }
  0x20   :  { %109 = vmatprep.subr.mxu0 %v54_v19  ;;  %v407_v62 = vld [vmem:[#allocation2 + $0x28] sm:$0xff]  ;;  %v406_v63 = vld [vmem:[#allocation2 + $0x20] sm:$0xff]  ;;  %v465_v6 = vld [vmem:[#allocation2 + $0x1f8] sm:$0xff] }
  0x21   :  { %110 = vmatpush1.msra.mxu0 %v53_v20  ;;  %v403_v3 = vld [vmem:[#allocation2 + $0x8] sm:$0xff]  ;;  %v402_v5 = vld [vmem:[#allocation2] sm:$0xff]  ;;  %v464_v8 = vld [vmem:[#allocation2 + $0x1f0] sm:$0xff] }
  0x22   :  { %111 = vmatprep.subr.mxu0 %v52_v21  ;;  %v463_v10 = vld [vmem:[#allocation2 + $0x1e8] sm:$0xff]  ;;  %v462_v12 = vld [vmem:[#allocation2 + $0x1e0] sm:$0xff]  ;;  %v461_v14 = vld [vmem:[#allocation2 + $0x1d8] sm:$0xff] }
  0x23   :  { %112 = vmatpush1.msra.mxu0 %v51_v23  ;;  %v460_v16 = vld [vmem:[#allocation2 + $0x1d0] sm:$0xff]  ;;  %v459_v17 = vld [vmem:[#allocation2 + $0x1c8] sm:$0xff] }
  0x24   :  { %113 = vmatprep.subr.mxu0 %v50_v25  ;;  %v456_v25 = vld [vmem:[#allocation2 + $0x1b0] sm:$0xff] }
  0x25   :  { %114 = vmatpush1.msra.mxu0 %v49_v26  ;;  %v454_v26 = vld [vmem:[#allocation2 + $0x1a0] sm:$0xff] }
  0x26   :  { %115 = vmatprep.subr.mxu0 %v48_v27  ;;  %v452_v27 = vld [vmem:[#allocation2 + $0x190] sm:$0xff] }
  0x27   :  { %116 = vmatpush1.msra.mxu0 %v47_v28  ;;  %v451_v28 = vld [vmem:[#allocation2 + $0x188] sm:$0xff] }
  0x28   :  { %117 = vmatprep.subr.mxu0 %v46_v29  ;;  %v449_v29 = vld [vmem:[#allocation2 + $0x178] sm:$0xff] }
  0x29   :  { %118 = vmatpush1.msra.mxu0 %v45_v30  ;;  %v448_v30 = vld [vmem:[#allocation2 + $0x170] sm:$0xff] }
  0x2a   :  { %902 = vmatmul.mubr.msk.f32.vlgmr.msra.gmra.mxu0 %vm80_vm0, %v1138_v2  ;;  %479 = vmatprep.subr.mxu0 %v433_v31  ;;  %v404_v2 = vld [vmem:[#allocation2 + $0x10] sm:$0xff]  ;;  %v447_v31 = vld [vmem:[#allocation2 + $0x168] sm:$0xff] }
  0x2b   :  { %157 = vmatprep.mubr.f32.mxu0 %v1085_v0  ;;  %480 = vmatpush1.msra.mxu0 %v432_v32  ;;  %v446_v32 = vld [vmem:[#allocation2 + $0x160] sm:$0xff] }
  0x2c   :  { %481 = vmatprep.subr.mxu0 %v431_v33  ;;  %v445_v33 = vld [vmem:[#allocation2 + $0x158] sm:$0xff] }
  0x2d   :  { %482 = vmatpush1.msra.mxu0 %v430_v34  ;;  %v444_v34 = vld [vmem:[#allocation2 + $0x150] sm:$0xff] }
  0x2e   :  { %903 = vmatmul.mubr.msk.f32.gmra.mxu0 %vm80_vm0, %v1133_v1  ;;  %483 = vmatprep.subr.mxu0 %v429_v35  ;;  %v405_v1 = vld [vmem:[#allocation2 + $0x18] sm:$0xff]  ;;  %v443_v35 = vld [vmem:[#allocation2 + $0x148] sm:$0xff] }
  0x2f   :  { %484 = vmatpush1.msra.mxu0 %v428_v36  ;;  %v442_v36 = vld [vmem:[#allocation2 + $0x140] sm:$0xff] }
  0x30   :  { %485 = vmatprep.subr.mxu0 %v427_v37  ;;  %v441_v37 = vld [vmem:[#allocation2 + $0x138] sm:$0xff] }
  0x31   :  { %486 = vmatpush1.msra.mxu0 %v426_v38  ;;  %v440_v38 = vld [vmem:[#allocation2 + $0x130] sm:$0xff] }
  0x32   :  { %487 = vmatprep.subr.mxu0 %v425_v39  ;;  %v439_v39 = vld [vmem:[#allocation2 + $0x128] sm:$0xff] }
  0x33   :  { %488 = vmatpush1.msra.mxu0 %v424_v41  ;;  %v437_v41 = vld [vmem:[#allocation2 + $0x118] sm:$0xff] }
  0x34   :  { %489 = vmatprep.subr.mxu0 %v423_v42  ;;  %v436_v42 = vld [vmem:[#allocation2 + $0x110] sm:$0xff] }
  0x35   :  { %490 = vmatpush1.msra.mxu0 %v422_v43  ;;  %v435_v43 = vld [vmem:[#allocation2 + $0x108] sm:$0xff] }
  0x36   :  { %387 = vadd.xlane.f32.xlu0 %v386_v44  ;;  %491 = vmatprep.subr.mxu0 %v421_v45  ;;  %v434_v44 = vld [vmem:[#allocation2 + $0x100] sm:$0xff]  ;;  %v596_v45 = vld [vmem:[%s1499_s4 + $0x78] sm:$0xff] }
  0x37   :  { %492 = vmatpush1.msra.mxu0 %v420_v46  ;;  %v595_v46 = vld [vmem:[%s1499_s4 + $0x70] sm:$0xff] }
  0x38   :  { %493 = vmatprep.subr.mxu0 %v419_v48  ;;  %v593_v48 = vld [vmem:[%s1499_s4 + $0x60] sm:$0xff] }
  0x39   :  { %494 = vmatpush1.msra.mxu0 %v418_v49  ;;  %v592_v49 = vld [vmem:[%s1499_s4 + $0x58] sm:$0xff] }
  0x3a   :  { %495 = vmatprep.subr.mxu0 %v417_v50  ;;  %v591_v50 = vld [vmem:[%s1499_s4 + $0x50] sm:$0xff] }
  0x3b   :  { %390 = vadd.xlane.f32.xlu1 %v389_v51  ;;  %496 = vmatpush1.msra.mxu0 %v416_v52  ;;  %v590_v51 = vld [vmem:[%s1499_s4 + $0x48] sm:$0xff]  ;;  %v589_v52 = vld [vmem:[%s1499_s4 + $0x40] sm:$0xff] }
  0x3c   :  { %497 = vmatprep.subr.mxu0 %v415_v53  ;;  %v588_v53 = vld [vmem:[%s1499_s4 + $0x38] sm:$0xff] }
  0x3d   :  { %498 = vmatpush1.msra.mxu0 %v414_v54  ;;  %v587_v54 = vld [vmem:[%s1499_s4 + $0x30] sm:$0xff] }
  0x3e   :  { %499 = vmatprep.subr.mxu0 %v413_v55  ;;  %v586_v55 = vld [vmem:[%s1499_s4 + $0x28] sm:$0xff] }
  0x3f   :  { %500 = vmatpush1.msra.mxu0 %v412_v57  ;;  %v584_v57 = vld [vmem:[%s1499_s4 + $0x18] sm:$0xff] }
  0x40   :  { %501 = vmatprep.subr.mxu0 %v411_v58 }
  0x41   :  { %502 = vmatpush1.msra.mxu0 %v410_v59  ;;  %v70_v59 = vlaneseq }
  0x42   :  { %503 = vmatprep.subr.mxu0 %v409_v60 }
  0x43   :  { %504 = vmatpush1.msra.mxu0 %v408_v61 }
  0x44   :  { %505 = vmatprep.subr.mxu0 %v407_v62  ;;  %v71_v62 = vshrl.u32 %v70_v59, 7  ;;  %v600_v59 = vld [vmem:[%s1499_s4 + $0x98] sm:$0xff] }
  0x45   :  { %506 = vmatpush1.msra.mxu0 %v406_v63 }
  0x46   :  { %507 = vmatprep.subr.mxu0 %v405_v1 }
  0x47   :  { %508 = vmatpush1.msra.mxu0 %v404_v2  ;;  %v1344_v2 = vsub.s32 1, %v71_v62 }
  0x48   :  { %509 = vmatprep.subr.mxu0 %v403_v3  ;;  %v901_v3 = vld [vmem:[%s1497_s2 + $0xc0] ss:$8 sm:$0x3] }
  0x49   :  { %510 = vmatpush1.msra.mxu0 %v402_v5 }
  0x4a   :  { %511 = vmatprep.subr.mxu0 %v465_v6 }
  0x4b   :  { %512 = vmatpush2.msra.mxu0 %v464_v8 }
  0x4c   :  { %277 = vperm.xlu1 %1042, %v41_v40   ;;  %171 = vperm.xlu0 %1041, %v41_v40  }
  0x4d   :  { %513 = vmatprep.subr.mxu0 %v463_v10  ;;  %v77_v10 = vrot.slane %v901_v3, %v1344_v2 }
  0x4e   :  { %514 = vmatpush2.msra.mxu0 %v462_v12 }
  0x4f   :  { %515 = vmatprep.subr.mxu0 %v461_v14 }
  0x50   :  { %1043 = vset.pattern.permute.xlu1 %v1090_v56  ;;  %1047 = vset.pattern.permute.xlu0 %v1090_v56 }
  0x51   :  { %374 = vperm.xlu1 %1043, %v41_v40   ;;  %516 = vmatpush2.msra.mxu0 %v460_v16  ;;  %v438_v40 = vld [vmem:[#allocation2 + $0x120] sm:$0xff]  ;;  %v168_v16 = vld [vmem:[%s1497_s2 + $0xc8] ss:$0 sm:$0xff] }
  0x52   :  { %517 = vmatprep.subr.mxu0 %v459_v17 }
  0x55   :  { %1044 = vset.pattern.permute.xlu1 %v1089_v24 }
  0x56   :  { %176 = vperm.xlu1 %1044, %v42_v47  }
  0x5a   :  { %1045 = vset.pattern.permute.xlu1 %v1088_v22 }
  0x5b   :  { %281 = vperm.xlu1 %1045, %v42_v47  }
  0x5f   :  { %1046 = vset.pattern.permute.xlu1 %v1090_v56  ;;  %v585_v56 = vld [vmem:[%s1499_s4 + $0x20] sm:$0xff] }
  0x60   :  { %378 = vperm.xlu1 %1046, %v42_v47   ;;  %v594_v47 = vld [vmem:[%s1499_s4 + $0x68] sm:$0xff] }
  0x80   :  { %v188_v18 = vpop.permute.xlu1 %187 }
  0x81   :  { %v184_v19 = vpop.permute.xlu0 %183 }
  0x85   :  { %v190_v20 = vpop.permute.xlu1 %189  ;;  %v186_v21 = vpop.permute.xlu0 %185 }
  0x86   :  { %v193_v22 = vsel %vm191_vm2, %v188_v18, %v190_v20  ;;  %v192_v23 = vsel %vm191_vm2, %v184_v19, %v186_v21 }
  0x87   :  { %968 = vmatprep.mubr.msk.f32.mxu1 %vm194_vm3, %v192_v23 }
  0x88   :  { %969 = vmatmul.mubr.msk.f32.vlgmr.msra.gmra.mxu1 %vm194_vm3, %v193_v22 }
  0x89   :  { %972 = vmatpush3.msra.mxu1 %v1150_v4  ;;  %v289_v24 = vpop.permute.xlu0 %288  ;;  %v291_v4 = vpop.permute.xlu1 %290 }
  0x8a   :  { %973 = vmatprep.subr.mxu1 %v1162_v7  ;;  %983 = vmatprep.mubr.msk.f32.mxu1 %vm194_vm3, %v289_v24 }
  0x8b   :  { %974 = vmatpush3.msra.mxu1 %v1162_v7  ;;  %v458_v7 = vld [vmem:[#allocation2 + $0x1c0] sm:$0xff] }
  0x8c   :  { %975 = vmatprep.subr.mxu1 %v1173_v9  ;;  %518 = vmatpush2.msra.mxu0 %v458_v7 }
  0x8d   :  { %976 = vmatpush3.msra.mxu1 %v1173_v9  ;;  %v457_v9 = vld [vmem:[#allocation2 + $0x1b8] sm:$0xff] }
  0x8e   :  { %977 = vmatprep.subr.mxu1 %v1186_v11  ;;  %519 = vmatprep.subr.mxu0 %v457_v9 }
  0x8f   :  { %978 = vmatpush3.msra.mxu1 %v1186_v11  ;;  %520 = vmatpush2.msra.mxu0 %v456_v25  ;;  %v455_v11 = vld [vmem:[#allocation2 + $0x1a8] sm:$0xff] }
  0x90   :  { %979 = vmatprep.subr.mxu1 %v1196_v13  ;;  %521 = vmatprep.subr.mxu0 %v455_v11 }
  0x91   :  { %980 = vmatpush3.msra.mxu1 %v1196_v13  ;;  %522 = vmatpush2.msra.mxu0 %v454_v26  ;;  %v453_v13 = vld [vmem:[#allocation2 + $0x198] sm:$0xff] }
  0x92   :  { %981 = vmatprep.subr.mxu1 %v1206_v15  ;;  %523 = vmatprep.subr.mxu0 %v453_v13 }
  0x93   :  { %982 = vmatpush3.msra.mxu1 %v1206_v15  ;;  %524 = vmatpush2.msra.mxu0 %v452_v27  ;;  %v450_v15 = vld [vmem:[#allocation2 + $0x180] sm:$0xff]  ;;  %v1359_v27 = vsub.s32 0, %v71_v62 }
  0x94   :  { %984 = vmatmul.mubr.msk.f32.vlgmr.msra.gmra.mxu1 %vm194_vm3, %v291_v4  ;;  %617 = vmatprep.subr.mxu1 %v1085_v0  ;;  %v597_v62 = vld [vmem:[%s1499_s4 + $0x80] sm:$0xff] }
  0x95   :  { %525 = vmatprep.subr.mxu0 %v451_v28  ;;  %618 = vmatpush1.msra.mxu1 %v596_v45 }
  0x96   :  { %526 = vmatpush2.msra.mxu0 %v450_v15  ;;  %619 = vmatprep.subr.mxu1 %v1085_v0 }
  0x97   :  { %527 = vmatprep.subr.mxu0 %v449_v29  ;;  %620 = vmatpush1.msra.mxu1 %v595_v46 }
  0x98   :  { %528 = vmatpush2.msra.mxu0 %v448_v30  ;;  %621 = vmatprep.subr.mxu1 %v1085_v0 }
  0x99   :  { %529 = vmatprep.subr.mxu0 %v447_v31  ;;  %622 = vmatpush1.msra.mxu1 %v594_v47 }
  0x9a   :  { %530 = vmatpush2.msra.mxu0 %v446_v32  ;;  %623 = vmatprep.subr.mxu1 %v1085_v0 }
  0x9b   :  { %531 = vmatprep.subr.mxu0 %v445_v33  ;;  %624 = vmatpush1.msra.mxu1 %v593_v48 }
  0x9c   :  { %532 = vmatpush2.msra.mxu0 %v444_v34  ;;  %625 = vmatprep.subr.mxu1 %v1085_v0 }
  0x9d   :  { %533 = vmatprep.subr.mxu0 %v443_v35  ;;  %626 = vmatpush1.msra.mxu1 %v592_v49  ;;  %v73_v35 = vrot.slane %v901_v3, %v1359_v27  ;;  %v557_v3 = vld [vmem:[#allocation2 + $0x210] ss:$8 sm:$0x3] }
  0x9e   :  { %534 = vmatpush2.msra.mxu0 %v442_v36  ;;  %627 = vmatprep.subr.mxu1 %v1085_v0 }
  0x9f   :  { %535 = vmatprep.subr.mxu0 %v441_v37  ;;  %628 = vmatpush1.msra.mxu1 %v591_v50 }
  0xa0   :  { %536 = vmatpush2.msra.mxu0 %v440_v38  ;;  %629 = vmatprep.subr.mxu1 %v1085_v0 }
  0xa1   :  { %537 = vmatprep.subr.mxu0 %v439_v39  ;;  %630 = vmatpush1.msra.mxu1 %v590_v51  ;;  %v583_v51 = vld [vmem:[%s1499_s4 + $0x10] sm:$0xff] }
  0xa2   :  { %538 = vmatpush2.msra.mxu0 %v438_v40  ;;  %631 = vmatprep.subr.mxu1 %v1085_v0 }
  0xa3   :  { %539 = vmatprep.subr.mxu0 %v437_v41  ;;  %632 = vmatpush1.msra.mxu1 %v589_v52  ;;  %v582_v52 = vld [vmem:[%s1499_s4 + $0x8] sm:$0xff] }
  0xa4   :  { %540 = vmatpush2.msra.mxu0 %v436_v42  ;;  %633 = vmatprep.subr.mxu1 %v1085_v0 }
  0xa5   :  { %541 = vmatprep.subr.mxu0 %v435_v43  ;;  %634 = vmatpush1.msra.mxu1 %v588_v53  ;;  %v581_v53 = vld [vmem:[%s1499_s4] sm:$0xff] }
  0xa6   :  { %542 = vmatpush2.msra.mxu0 %v434_v44  ;;  %635 = vmatprep.subr.mxu1 %v1085_v0 }
  0xa7   :  { %636 = vmatpush1.msra.mxu1 %v587_v54  ;;  %v604_v54 = vld [vmem:[%s1499_s4 + $0xb8] sm:$0xff] }
  0xa8   :  { %637 = vmatprep.subr.mxu1 %v1085_v0 }
  0xa9   :  { %638 = vmatpush1.msra.mxu1 %v586_v55  ;;  %v603_v55 = vld [vmem:[%s1499_s4 + $0xb0] sm:$0xff] }
  0xaa   :  { %639 = vmatprep.subr.mxu1 %v1085_v0 }
  0xab   :  { %640 = vmatpush1.msra.mxu1 %v585_v56  ;;  %v602_v56 = vld [vmem:[%s1499_s4 + $0xa8] sm:$0xff] }
  0xac   :  { %641 = vmatprep.subr.mxu1 %v1085_v0 }
  0xad   :  { %642 = vmatpush1.msra.mxu1 %v584_v57  ;;  %v601_v57 = vld [vmem:[%s1499_s4 + $0xa0] sm:$0xff] }
  0xae   :  { %643 = vmatprep.subr.mxu1 %v1085_v0 }
  0xaf   :  { %644 = vmatpush1.msra.mxu1 %v583_v51 }
  0xb0   :  { %645 = vmatprep.subr.mxu1 %v1085_v0 }
  0xb1   :  { %646 = vmatpush1.msra.mxu1 %v582_v52  ;;  %v908_v52 = vld [vmem:[%s1499_s4 + $0xc0] ss:$0 sm:$0xff] }
  0xb2   :  { %647 = vmatprep.subr.mxu1 %v1085_v0 }
  0xb3   :  { %648 = vmatpush1.msra.mxu1 %v581_v53 }
  0xb4   :  { %665 = vmatprep.subr.mxu1 %v1085_v0 }
  0xb5   :  { %666 = vmatpush2.msra.mxu1 %v604_v54 }
  0xb6   :  { %667 = vmatprep.subr.mxu1 %v1085_v0 }
  0xb7   :  { %668 = vmatpush2.msra.mxu1 %v603_v55 }
  0xb8   :  { %669 = vmatprep.subr.mxu1 %v1085_v0 }
  0xb9   :  { %670 = vmatpush2.msra.mxu1 %v602_v56 }
  0xba   :  { %671 = vmatprep.subr.mxu1 %v1085_v0 }
  0xbb   :  { %672 = vmatpush2.msra.mxu1 %v601_v57 }
  0xbc   :  { %673 = vmatprep.subr.mxu1 %v1085_v0 }
  0xbd   :  { %674 = vmatpush2.msra.mxu1 %v600_v59 }
  0xbe   :  { %675 = vmatprep.subr.mxu1 %v1085_v0 }
  0xbf   :  { %v1349_v6 = vpop.xlane.xlu0 %387 }
  0xc0   :  { %vm392_vm4 = vcmp.eq.f32.partialorder %v1349_v6, 0.0 }
  0xc1   :  { %v394_v18 = vsel %vm392_vm4, 1.0, %v1349_v6 }
  0xc2   :  { %1048 = vrcp.f32 %v394_v18  ;;  %v566_v18 = vrot.slane %v557_v3, %v1344_v2 }
  0xc4   :  { %v1342_v58 = vpop.xlane.xlu1 %390 }
  0xc5   :  { %vm393_vm5 = vcmp.eq.f32.partialorder %v1342_v58, 0.0 }
  0xc6   :  { %v395_v23 = vsel %vm393_vm5, 1.0, %v1342_v58 }
  0xc7   :  { %1050 = vrcp.f32 %v395_v23  ;;  %v172_v11 = vpop.permute.xlu0 %171 }
  0xc8   :  { %v278_v61 = vpop.permute.xlu1 %277 }
  0xcc   :  { %v375_v1 = vpop.permute.xlu1 %374 }
  0xcf   :  { %v1049_v44 = vpop.eup %1048 }
  0xd1   :  { %v177_v14 = vpop.permute.xlu1 %176 }
  0xd4   :  { %v1051_v46 = vpop.eup %1050 }
  0xd6   :  { %v282_v7 = vpop.permute.xlu1 %281 }
  0xdb   :  { %v379_v30 = vpop.permute.xlu1 %378 }
  0xea   :  { %v153_v60 = vpop.f32.mrf.mxu0 }
  0xeb   :  { %v154_v41 = vadd.f32 %v153_v60, %v73_v35  ;;  %v599_v60 = vld [vmem:[%s1499_s4 + $0x90] sm:$0xff] }
  0xec   :  { %v155_v63 = vpop.f32.mrf.mxu0  ;;  %676 = vmatpush2.msra.mxu1 %v599_v60 }
  0xed   :  { %v156_v19 = vadd.f32 %v155_v63, %v77_v10  ;;  %v164_v47 = vmax.f32 %v154_v41, 0.0  ;;  %677 = vmatprep.subr.mxu1 %v1085_v0  ;;  %v713_v63 = vld [vmem:[%s1500_s5 + $0x98] sm:$0xff]  ;;  %v702_v41 = vld [vmem:[%s1500_s5 + $0x40] sm:$0xff] }
  0xee   :  { %v159_v5 = vpop.f32.mrf.mxu0 }
  0xef   :  { %v165_v24 = vmax.f32 %v156_v19, 0.0  ;;  %v160_v48 = vadd.f32 %v159_v5, %v73_v35  ;;  %v400_v5 = vmul.f32 %v1049_v44, %v1349_v6  ;;  %v708_v35 = vld [vmem:[%s1500_s5 + $0x70] sm:$0xff] }
  0xf0   :  { %v161_v12 = vpop.f32.mrf.mxu0 }
  0xf1   :  { %v162_v20 = vadd.f32 %v161_v12, %v77_v10  ;;  %v179_v15 = vmul.f32 %v172_v11, %v165_v24  ;;  %v166_v50 = vmax.f32 %v160_v48, 0.0  ;;  %v562_v10 = vrot.slane %v557_v3, %v1359_v27 }
  0xf3   :  { %v167_v4 = vmax.f32 %v162_v20, 0.0 }
  0xf5   :  { %v180_v28 = vmul.f32 %v177_v14, %v167_v4 }
 0x148   :  { %v970_v8 = vpop.f32.mrf.mxu1 }
 0x149   :  { %v271_v21 = vadd.f32 %v970_v8, %v168_v16 }
 0x14a   :  { %v265_v17 = vpop.f32.mrf.mxu1 }
 0x14b   :  { %v266_v22 = vadd.f32 %v265_v17, %v168_v16  ;;  %v275_v9 = vmax.f32 %v271_v21, 0.0  ;;  %v569_v17 = vmul.f32 %v562_v10, %v400_v5 }
 0x14d   :  { %v274_v25 = vmax.f32 %v266_v22, 0.0  ;;  %v285_v32 = vmul.f32 %v282_v7, %v275_v9  ;;  %v570_v22 = vmul.f32 %v566_v18, %v400_v5 }
 0x14f   :  { %v284_v31 = vmul.f32 %v278_v61, %v274_v25  ;;  %v287_v38 = vadd.f32 %v285_v32, %v180_v28  ;;  %v598_v61 = vld [vmem:[%s1499_s4 + $0x88] sm:$0xff]  ;;  %v698_v28 = vld [vmem:[%s1500_s5 + $0x20] sm:$0xff] }
 0x150   :  { %678 = vmatpush2.msra.mxu1 %v598_v61  ;;  %v711_v32 = vld [vmem:[%s1500_s5 + $0x88] sm:$0xff] }
 0x151   :  { %v286_v39 = vadd.f32 %v284_v31, %v179_v15  ;;  %679 = vmatprep.subr.mxu1 %v1085_v0 }
 0x152   :  { %680 = vmatpush2.msra.mxu1 %v597_v62 }
 0x153   :  { %986 = vmatprep.subr.mxu1 %v713_v63 }
 0x154   :  { %v985_v26 = vpop.f32.mrf.mxu1 }
 0x155   :  { %v368_v13 = vadd.f32 %v985_v26, %v168_v16  ;;  %v700_v26 = vld [vmem:[%s1500_s5 + $0x30] sm:$0xff] }
 0x156   :  { %v362_v29 = vpop.f32.mrf.mxu1 }
 0x157   :  { %v372_v33 = vmax.f32 %v368_v13, 0.0  ;;  %v363_v34 = vadd.f32 %v362_v29, %v168_v16  ;;  %v401_v16 = vmul.f32 %v1051_v46, %v1342_v58  ;;  %v699_v13 = vld [vmem:[%s1500_s5 + $0x28] sm:$0xff] }
 0x159   :  { %v371_v36 = vmax.f32 %v363_v34, 0.0  ;;  %v382_v37 = vmul.f32 %v379_v30, %v372_v33  ;;  %v571_v4 = vmul.f32 %v562_v10, %v401_v16  ;;  %v572_v11 = vmul.f32 %v566_v18, %v401_v16  ;;  %v712_v30 = vld [vmem:[%s1500_s5 + $0x90] sm:$0xff]  ;;  %v710_v33 = vld [vmem:[%s1500_s5 + $0x80] sm:$0xff]  ;;  %v709_v34 = vld [vmem:[%s1500_s5 + $0x78] sm:$0xff] }
 0x15b   :  { %v381_v40 = vmul.f32 %v375_v1, %v371_v36  ;;  %v384_v43 = vadd.f32 %v382_v37, %v287_v38  ;;  %v467_v1 = vld [vmem:[#allocation2 + $0x200] ss:$8 sm:$0x3]  ;;  %v705_v38 = vld [vmem:[%s1500_s5 + $0x58] sm:$0xff] }
 0x15c   :  { %v472_v8 = vrot.slane %v467_v1, %v1359_v27  ;;  %v476_v12 = vrot.slane %v467_v1, %v1344_v2  ;;  %v701_v2 = vld [vmem:[%s1500_s5 + $0x38] sm:$0xff]  ;;  %v707_v36 = vld [vmem:[%s1500_s5 + $0x68] sm:$0xff]  ;;  %v706_v37 = vld [vmem:[%s1500_s5 + $0x60] sm:$0xff] }
 0x15d   :  { %v383_v42 = vadd.f32 %v381_v40, %v286_v39  ;;  %v399_v49 = vmul.f32 %v1051_v46, %v384_v43  ;;  %1013 = vmatprep.subr.mxu0 %v701_v2  ;;  %v704_v39 = vld [vmem:[%s1500_s5 + $0x50] sm:$0xff]  ;;  %v703_v40 = vld [vmem:[%s1500_s5 + $0x48] sm:$0xff]  ;;  %v915_v1 = vld [vmem:[%s1500_s5 + $0xa0] ss:$0 sm:$0xff] }
 0x15e   :  { %v696_v43 = vld [vmem:[%s1500_s5 + $0x10] sm:$0xff] }
 0x15f   :  { %v398_v45 = vmul.f32 %v1049_v44, %v383_v42  ;;  %v697_v42 = vld [vmem:[%s1500_s5 + $0x18] sm:$0xff]  ;;  %v695_v44 = vld [vmem:[%s1500_s5 + $0x8] sm:$0xff] }
 0x161   :  { %543 = vmatprep.mubr.f32.mxu0 %v398_v45  ;;  %v694_v45 = vld [vmem:[%s1500_s5] sm:$0xff] }
 0x162   :  { %544 = vmatmul.mubr.f32.vlgmr.msra.gmra.mxu0 %v164_v47 }
 0x163   :  { %549 = vmatprep.mubr.f32.mxu0 %v399_v49  ;;  %1014 = vmatpush3.msra.mxu0 %v701_v2 }
 0x164   :  { %1015 = vmatprep.subr.mxu0 %v700_v26 }
 0x165   :  { %1016 = vmatpush3.msra.mxu0 %v700_v26 }
 0x166   :  { %550 = vmatmul.mubr.f32.gmra.mxu0 %v166_v50  ;;  %1017 = vmatprep.subr.mxu0 %v699_v13 }
 0x167   :  { %1018 = vmatpush3.msra.mxu0 %v699_v13 }
 0x168   :  { %1019 = vmatprep.subr.mxu0 %v698_v28 }
 0x169   :  { %1020 = vmatpush3.msra.mxu0 %v698_v28 }
 0x16a   :  { %1021 = vmatprep.subr.mxu0 %v697_v42 }
 0x16b   :  { %1022 = vmatpush3.msra.mxu0 %v697_v42 }
 0x16c   :  { %1023 = vmatprep.subr.mxu0 %v696_v43 }
 0x16d   :  { %1024 = vmatpush3.msra.mxu0 %v696_v43 }
 0x16e   :  { %1025 = vmatprep.subr.mxu0 %v695_v44 }
 0x16f   :  { %1026 = vmatpush3.msra.mxu0 %v695_v44 }
 0x170   :  { %1027 = vmatprep.subr.mxu0 %v694_v45 }
 0x171   :  { %1028 = vmatpush3.msra.mxu0 %v694_v45 }
 0x222   :  { %v545_v14 = vpop.f32.mrf.mxu0 }
 0x223   :  { %v546_v0 = vadd.f32 %v545_v14, %v472_v8 }
 0x224   :  { %v547_v19 = vpop.f32.mrf.mxu0 }
 0x225   :  { %v573_v20 = vadd.f32 %v569_v17, %v546_v0  ;;  %v548_v21 = vadd.f32 %v547_v19, %v476_v12 }
 0x226   :  { %v551_v23 = vpop.f32.mrf.mxu0 }
 0x227   :  { %1052 = vtanh.f32 %v573_v20  ;;  %v574_v6 = vadd.f32 %v570_v22, %v548_v21  ;;  %v552_v24 = vadd.f32 %v551_v23, %v472_v8 }
 0x228   :  { %v553_v7 = vpop.f32.mrf.mxu0 }
 0x229   :  { %1054 = vtanh.f32 %v574_v6  ;;  %v575_v9 = vadd.f32 %v571_v4, %v552_v24  ;;  %v554_v25 = vadd.f32 %v553_v7, %v476_v12 }
 0x22b   :  { %1056 = vtanh.f32 %v575_v9  ;;  %v576_v58 = vadd.f32 %v572_v11, %v554_v25 }
 0x22d   :  { %1058 = vtanh.f32 %v576_v58 }
 0x234   :  { %v1053_v27 = vpop.eup %1052 }
 0x235   :  { %716 = vrot.lane.b32.xlu1 %v1053_v27, %s1086_s8 }
 0x236   :  { %v1055_v15 = vpop.eup %1054 }
 0x237   :  { %909 = vmatprep.mubr.msk.f32.mxu1 %vm610_vm6, %v1055_v15 }
 0x238   :  { %v1057_v29 = vpop.eup %1056  ;;  %682 = vmatmul.mubr.f32.vlgmr.msra.gmra.mxu1 %v1053_v27 }
 0x239   :  { %720 = vrot.lane.b32.xlu0 %v1057_v29, %s1086_s8  ;;  %718 = vrot.lane.b32.xlu1 %v1055_v15, %s1086_s8 }
 0x23a   :  { %v1059_v31 = vpop.eup %1058  ;;  %987 = vmatpush3.msra.mxu1 %v713_v63 }
 0x23b   :  { %910 = vmatprep.mubr.msk.f32.mxu1 %vm610_vm6, %v1059_v31  ;;  %988 = vmatprep.subr.mxu1 %v712_v30 }
 0x23c   :  { %687 = vmatmul.mubr.f32.gmra.mxu1 %v1057_v29 }
 0x23d   :  { %722 = vrot.lane.b32.xlu1 %v1059_v31, %s1086_s8  ;;  %989 = vmatpush3.msra.mxu1 %v712_v30 }
 0x23e   :  { %990 = vmatprep.subr.mxu1 %v711_v32 }
 0x23f   :  { %991 = vmatpush3.msra.mxu1 %v711_v32 }
 0x240   :  { %992 = vmatprep.subr.mxu1 %v710_v33 }
 0x241   :  { %993 = vmatpush3.msra.mxu1 %v710_v33 }
 0x242   :  { %994 = vmatprep.subr.mxu1 %v709_v34 }
 0x243   :  { %995 = vmatpush3.msra.mxu1 %v709_v34 }
 0x244   :  { %996 = vmatprep.subr.mxu1 %v708_v35 }
 0x245   :  { %997 = vmatpush3.msra.mxu1 %v708_v35 }
 0x246   :  { %998 = vmatprep.subr.mxu1 %v707_v36 }
 0x247   :  { %999 = vmatpush3.msra.mxu1 %v707_v36 }
 0x248   :  { %1000 = vmatprep.subr.mxu1 %v706_v37 }
 0x249   :  { %1001 = vmatpush3.msra.mxu1 %v706_v37 }
 0x24a   :  { %1002 = vmatprep.subr.mxu1 %v705_v38 }
 0x24b   :  { %1003 = vmatpush3.msra.mxu1 %v705_v38 }
 0x24c   :  { %1004 = vmatprep.subr.mxu1 %v704_v39 }
 0x24d   :  { %1005 = vmatpush3.msra.mxu1 %v704_v39 }
 0x24e   :  { %1006 = vmatprep.subr.mxu1 %v703_v40 }
 0x24f   :  { %1007 = vmatpush3.msra.mxu1 %v703_v40 }
 0x250   :  { %1008 = vmatprep.subr.mxu1 %v702_v41 }
 0x251   :  { %1009 = vmatpush3.msra.mxu1 %v702_v41 }
 0x2a7   :  { %v717_v46 = vpop.permute.xlu1 %716 }
 0x2ab   :  { %v719_v47 = vpop.permute.xlu1 %718  ;;  %v721_v49 = vpop.permute.xlu0 %720 }
 0x2ac   :  { %v724_v48 = vsel %vm191_vm2, %v717_v46, %v719_v47 }
 0x2ad   :  { %1010 = vmatprep.mubr.msk.f32.mxu1 %vm80_vm0, %v724_v48 }
 0x2af   :  { %v723_v50 = vpop.permute.xlu1 %722 }
 0x2b0   :  { %v725_v51 = vsel %vm191_vm2, %v721_v49, %v723_v50 }
 0x2b1   :  { %1011 = vmatmul.mubr.msk.f32.vlgmr.msra.gmra.mxu1 %vm80_vm0, %v725_v51 }
 0x2f8   :  { %v683_v53 = vpop.f32.mrf.mxu1 }
 0x2f9   :  { %v684_v54 = vadd.f32 %v908_v52, %v683_v53 }
 0x2fa   :  { %v685_v55 = vpop.f32.mrf.mxu1 }
 0x2fb   :  { %v692_v56 = vmax.f32 %v684_v54, 0.0 }
 0x2fc   :  { %v688_v57 = vpop.f32.mrf.mxu1 }
 0x2fd   :  { %v689_v59 = vadd.f32 %v908_v52, %v688_v57  ;;  %1029 = vmatprep.mubr.msk.f32.mxu0 %vm610_vm6, %v692_v56 }
 0x2fe   :  { %v690_v60 = vpop.f32.mrf.mxu1 }
 0x2ff   :  { %v693_v61 = vmax.f32 %v689_v59, 0.0 }
 0x301   :  { %1030 = vmatmul.mubr.msk.f32.vlgmr.msra.gmra.mxu0 %vm610_vm6, %v693_v61 }
 0x371   :  { %v1012_v62 = vpop.f32.mrf.mxu1 }
 0x373   :  { %v796_v5 = vpop.f32.mrf.mxu1 }
 0x3c1   :  { %v1031_v63 = vpop.f32.mrf.mxu0 }
 0x3c2   :  { %v883_v3 = vadd.f32 %v1031_v63, %v1012_v62 }
 0x3c3   :  { %v877_v8 = vpop.f32.mrf.mxu0 }
 0x3c4   :  { %v892_v10 = vadd.f32 %v915_v1, %v883_v3  ;;  %v878_v12 = vadd.f32 %v877_v8, %v796_v5 }
 0x3c6   :  { %895 = vst.msk [vmem:[%s1501_s6 + $0x8] sm:$0xff] %vm893_vm7, %v892_v10  ;;  %v891_v14 = vadd.f32 %v915_v1, %v878_v12 }
 0x3c8   :  { %894 = vst.msk [vmem:[%s1501_s6] sm:$0xff] %vm893_vm7, %v891_v14 }
 0x3c9   :  { %900 = vsyncpa [#allocation3], 1 }

</bundles_post_ra>
